<compile_context>
chip_gen: v7x
topology: tpu7x:2x2x1
jax: 0.10.0
libtpu: 0.0.40
codegen_flags: <defaults>
</compile_context>

<pallas_src>
import functools

import jax
import jax.numpy as jnp
from jax import lax
from jax.experimental import pallas as pl
from jax.experimental.pallas import tpu as pltpu


LANE = 128


def _round_up(n, m=LANE):
    return ((n + m - 1) // m) * m


def _fused_decoder_kernel(*refs, n_layers, conditional, acts, eps):
    # refs layout:
    #   conditional:     (z_ref, c_ref, W0z, W0c, g0, b0, [W_i, g_i, b_i]*, o_ref)
    #   non-conditional: (z_ref,       W0,        g0, b0, [W_i, g_i, b_i]*, o_ref)
    #   W_* : (in, OUT_pad)  bf16, already transposed, zero-padded on the out axis
    #   g_i : (1, OUT_pad)   f32 BatchNorm gamma (padding = 1)
    #   b_i : (1, OUT_pad)   f32 BatchNorm beta  (padding = 0)
    #   o_ref : (B, OUT_pad_last) f32
    o_ref = refs[-1]

    def bn_act(h, gamma, beta, act):
        # Training-mode BatchNorm1d (biased variance), numerically-stable centered form.
        mean = jnp.mean(h, axis=0, keepdims=True)
        d = h - mean
        var = jnp.mean(d * d, axis=0, keepdims=True)
        scale = gamma * lax.rsqrt(var + eps)
        y = d * scale + beta
        if act == "relu":
            return jnp.maximum(y, 0.0)
        return jnp.tanh(y)

    if conditional:
        z_ref, c_ref = refs[0], refs[1]
        params = refs[2:-1]
        wz = params[0][...]
        wc = params[1][...]
        gamma = params[2][...]
        beta = params[3][...]
        # Fused "concat": h0 = [z, c] @ W0^T == z @ W0z + c @ W0c
        h = jnp.dot(z_ref[...].astype(wz.dtype), wz,
                    preferred_element_type=jnp.float32)
        h = h + jnp.dot(c_ref[...].astype(wc.dtype), wc,
                        preferred_element_type=jnp.float32)
        idx = 4
    else:
        z_ref = refs[0]
        params = refs[1:-1]
        w = params[0][...]
        gamma = params[1][...]
        beta = params[2][...]
        h = jnp.dot(z_ref[...].astype(w.dtype), w,
                    preferred_element_type=jnp.float32)
        idx = 3

    x = bn_act(h, gamma, beta, acts[0])

    for i in range(1, n_layers):
        w = params[idx][...]
        gamma = params[idx + 1][...]
        beta = params[idx + 2][...]
        idx += 3
        # Linear (bias omitted: BN's mean subtraction cancels it exactly).
        h = jnp.dot(x.astype(w.dtype), w, preferred_element_type=jnp.float32)
        x = bn_act(h, gamma, beta, acts[i])

    o_ref[...] = x.astype(o_ref.dtype)


class DecoderPallas:
    """JAX/Pallas equivalent of the PyTorch Decoder module (single fused kernel)."""

    def __init__(self, layer_sizes, latent_size, conditional, conditional_size, key):
        self.conditional = bool(conditional)
        self.layer_sizes = list(layer_sizes)
        self.latent_size = latent_size
        self.conditional_size = conditional_size if self.conditional else 0
        input_size = latent_size + self.conditional_size
        self.input_size = input_size
        self.eps = 1e-5
        self.acts = tuple(
            "relu" if (i + 1) < len(self.layer_sizes) else "tanh"
            for i in range(len(self.layer_sizes))
        )

        in_sizes = [input_size] + self.layer_sizes[:-1]
        self.flat_params = []   # per layer: (W[, Wc split for layer 0], gamma, beta)
        self.out_pads = []
        self._flops_per_row = 0
        for i, (in_size, out_size) in enumerate(zip(in_sizes, self.layer_sizes)):
            key, kw, kb, kg, kbt = jax.random.split(key, 5)
            bound = 1.0 / jnp.sqrt(jnp.float32(in_size))
            # nn.Linear weight, stored transposed: (in, out)
            w_t = jax.random.uniform(kw, (in_size, out_size), jnp.float32, -bound, bound)
            # Bias generated for parity with nn.Linear but intentionally unused:
            # training-mode BatchNorm centers h, cancelling a per-feature bias exactly.
            _bias = jax.random.uniform(kb, (out_size,), jnp.float32, -bound, bound)
            gamma = jnp.ones((out_size,), jnp.float32) + 0.01 * jax.random.normal(kg, (out_size,))
            beta = 0.01 * jax.random.normal(kbt, (out_size,))

            out_pad = _round_up(out_size)
            self.out_pads.append(out_pad)
            self._flops_per_row += 2 * in_size * out_pad

            def pad_w(mat, rows):
                buf = jnp.zeros((rows, out_pad), jnp.float32)
                buf = buf.at[: mat.shape[0], :out_size].set(mat)
                return buf.astype(jnp.bfloat16)          # bf16 weights: half the DMA bytes

            if i == 0 and self.conditional:
                # Split layer-0 weight: latent rows / conditional rows (fused concat).
                wz = pad_w(w_t[:latent_size, :], latent_size)
                wc = pad_w(w_t[latent_size:, :], self.conditional_size)
                self.flat_params.extend([wz, wc])
            else:
                # in dims of layers >= 1 are already lane-padded (previous out_pad).
                rows = in_size if i == 0 else self.out_pads[i - 1]
                self.flat_params.append(pad_w(w_t, rows))

            g_pad = jnp.ones((1, out_pad), jnp.float32).at[0, :out_size].set(gamma)
            b_pad = jnp.zeros((1, out_pad), jnp.float32).at[0, :out_size].set(beta)
            self.flat_params.extend([g_pad, b_pad])

        self._param_bytes = sum(int(p.size) * p.dtype.itemsize for p in self.flat_params)
        self._kernel = functools.partial(
            _fused_decoder_kernel,
            n_layers=len(self.layer_sizes),
            conditional=self.conditional,
            acts=self.acts,
            eps=self.eps,
        )

    def __call__(self, z, c=None):
        B = z.shape[0]
        assert z.shape[-1] == self.latent_size
        inputs = [z.astype(jnp.float32)]
        if self.conditional:
            assert c is not None and c.shape[-1] == self.conditional_size
            inputs.append(c.astype(jnp.float32))
        inputs.extend(self.flat_params)

        out_pad = self.out_pads[-1]
        io_bytes = (B * self.input_size + B * out_pad) * 4
        cost = pl.CostEstimate(
            flops=B * self._flops_per_row,
            transcendentals=B * out_pad,                      # final tanh
            bytes_accessed=self._param_bytes + io_bytes,
        )

        vmem_spec = pl.BlockSpec(memory_space=pltpu.MemorySpace.VMEM)
        fused = pl.pallas_call(
            self._kernel,
            out_shape=jax.ShapeDtypeStruct((B, out_pad), jnp.float32),
            in_specs=[vmem_spec] * len(inputs),
            out_specs=vmem_spec,
            cost_estimate=cost,
        )
        y_pad = fused(*inputs)
        return y_pad[:, : self.layer_sizes[-1]]


if __name__ == "__main__":
    key = jax.random.PRNGKey(0)
    k_params, k_z, k_c = jax.random.split(key, 3)

    # Small, forward-consistent shapes
    batch = 8
    latent_size = 16
    conditional_size = 8
    layer_sizes = [32, 64, 16]

    dec = DecoderPallas(
        layer_sizes=layer_sizes,
        latent_size=latent_size,
        conditional=True,
        conditional_size=conditional_size,
        key=k_params,
    )

    z = jax.random.normal(k_z, (batch, latent_size), jnp.float32)
    c = jax.random.normal(k_c, (batch, conditional_size), jnp.float32)

    out = dec(z, c)
    out = jax.block_until_ready(out)
    assert out.shape == (batch, layer_sizes[-1])
    assert bool(jnp.all(jnp.isfinite(out)))
    # tanh output must lie in [-1, 1]
    assert bool(jnp.all(jnp.abs(out) <= 1.0))
    print("KERNEL_OK")
</pallas_src>

<mosaic_0001>
module attributes {stable_mosaic.version = 11 : i64} {
  func.func @_fused_decoder_kernel(%arg0: memref<8x16xf32, #tpu.memory_space<vmem>>, %arg1: memref<8x8xf32, #tpu.memory_space<vmem>>, %arg2: memref<16x128xbf16, #tpu.memory_space<vmem>>, %arg3: memref<8x128xbf16, #tpu.memory_space<vmem>>, %arg4: memref<1x128xf32, #tpu.memory_space<vmem>>, %arg5: memref<1x128xf32, #tpu.memory_space<vmem>>, %arg6: memref<128x128xbf16, #tpu.memory_space<vmem>>, %arg7: memref<1x128xf32, #tpu.memory_space<vmem>>, %arg8: memref<1x128xf32, #tpu.memory_space<vmem>>, %arg9: memref<128x128xbf16, #tpu.memory_space<vmem>>, %arg10: memref<1x128xf32, #tpu.memory_space<vmem>>, %arg11: memref<1x128xf32, #tpu.memory_space<vmem>>, %arg12: memref<8x128xf32, #tpu.memory_space<vmem>>) attributes {dimension_semantics = [], scalar_prefetch = 0 : i64, scratch_operands = 0 : i64, tpu.core_type = #tpu.core_type<tc>} {
    %c0 = arith.constant 0 : index
    %c0_0 = arith.constant 0 : index
    %0 = vector.load %arg2[%c0, %c0_0] : memref<16x128xbf16, #tpu.memory_space<vmem>>, vector<16x128xbf16>
    %c0_1 = arith.constant 0 : index
    %c0_2 = arith.constant 0 : index
    %1 = vector.load %arg3[%c0_1, %c0_2] : memref<8x128xbf16, #tpu.memory_space<vmem>>, vector<8x128xbf16>
    %c0_3 = arith.constant 0 : index
    %c0_4 = arith.constant 0 : index
    %2 = vector.load %arg4[%c0_3, %c0_4] : memref<1x128xf32, #tpu.memory_space<vmem>>, vector<1x128xf32>
    %c0_5 = arith.constant 0 : index
    %c0_6 = arith.constant 0 : index
    %3 = vector.load %arg5[%c0_5, %c0_6] : memref<1x128xf32, #tpu.memory_space<vmem>>, vector<1x128xf32>
    %c0_7 = arith.constant 0 : index
    %c0_8 = arith.constant 0 : index
    %4 = vector.load %arg0[%c0_7, %c0_8] : memref<8x16xf32, #tpu.memory_space<vmem>>, vector<8x16xf32>
    %5 = arith.truncf %4 : vector<8x16xf32> to vector<8x16xbf16>
    %cst = arith.constant dense<0.000000e+00> : vector<8x128xf32>
    %6 = tpu.matmul %5, %0, %cst {dimension_numbers = #tpu.dot_dimension_numbers<[1], [0], [0], [1], [0, 0, 1, 1], [], []>} : vector<8x16xbf16>, vector<16x128xbf16>, vector<8x128xf32> -> vector<8x128xf32>
    %c0_9 = arith.constant 0 : index
    %c0_10 = arith.constant 0 : index
    %7 = vector.load %arg1[%c0_9, %c0_10] : memref<8x8xf32, #tpu.memory_space<vmem>>, vector<8x8xf32>
    %8 = arith.truncf %7 : vector<8x8xf32> to vector<8x8xbf16>
    %cst_11 = arith.constant dense<0.000000e+00> : vector<8x128xf32>
    %9 = tpu.matmul %8, %1, %cst_11 {dimension_numbers = #tpu.dot_dimension_numbers<[1], [0], [0], [1], [0, 0, 1, 1], [], []>} : vector<8x8xbf16>, vector<8x128xbf16>, vector<8x128xf32> -> vector<8x128xf32>
    %10 = arith.addf %6, %9 : vector<8x128xf32>
    %cst_12 = arith.constant dense<0.000000e+00> : vector<128xf32>
    %11 = vector.multi_reduction <add>, %10, %cst_12 [0] : vector<8x128xf32> to vector<128xf32>
    %12 = vector.shape_cast %11 : vector<128xf32> to vector<1x128xf32>
    %cst_13 = arith.constant 8.000000e+00 : f32
    %13 = vector.broadcast %cst_13 : f32 to vector<1x128xf32>
    %14 = arith.divf %12, %13 : vector<1x128xf32>
    %15 = vector.broadcast %14 : vector<1x128xf32> to vector<8x128xf32>
    %16 = arith.subf %10, %15 : vector<8x128xf32>
    %17 = arith.mulf %16, %16 : vector<8x128xf32>
    %cst_14 = arith.constant dense<0.000000e+00> : vector<128xf32>
    %18 = vector.multi_reduction <add>, %17, %cst_14 [0] : vector<8x128xf32> to vector<128xf32>
    %19 = vector.shape_cast %18 : vector<128xf32> to vector<1x128xf32>
    %cst_15 = arith.constant 8.000000e+00 : f32
    %20 = vector.broadcast %cst_15 : f32 to vector<1x128xf32>
    %21 = arith.divf %19, %20 : vector<1x128xf32>
    %cst_16 = arith.constant 9.99999974E-6 : f32
    %22 = vector.broadcast %cst_16 : f32 to vector<1x128xf32>
    %23 = arith.addf %21, %22 : vector<1x128xf32>
    %24 = math.rsqrt %23 : vector<1x128xf32>
    %25 = arith.mulf %2, %24 : vector<1x128xf32>
    %26 = vector.broadcast %25 : vector<1x128xf32> to vector<8x128xf32>
    %27 = arith.mulf %16, %26 : vector<8x128xf32>
    %28 = vector.broadcast %3 : vector<1x128xf32> to vector<8x128xf32>
    %29 = arith.addf %27, %28 : vector<8x128xf32>
    %cst_17 = arith.constant 0.000000e+00 : f32
    %30 = vector.broadcast %cst_17 : f32 to vector<8x128xf32>
    %31 = arith.maximumf %29, %30 : vector<8x128xf32>
    %c0_18 = arith.constant 0 : index
    %c0_19 = arith.constant 0 : index
    %32 = vector.load %arg6[%c0_18, %c0_19] : memref<128x128xbf16, #tpu.memory_space<vmem>>, vector<128x128xbf16>
    %c0_20 = arith.constant 0 : index
    %c0_21 = arith.constant 0 : index
    %33 = vector.load %arg7[%c0_20, %c0_21] : memref<1x128xf32, #tpu.memory_space<vmem>>, vector<1x128xf32>
    %c0_22 = arith.constant 0 : index
    %c0_23 = arith.constant 0 : index
    %34 = vector.load %arg8[%c0_22, %c0_23] : memref<1x128xf32, #tpu.memory_space<vmem>>, vector<1x128xf32>
    %35 = arith.truncf %31 : vector<8x128xf32> to vector<8x128xbf16>
    %cst_24 = arith.constant dense<0.000000e+00> : vector<8x128xf32>
    %36 = tpu.matmul %35, %32, %cst_24 {dimension_numbers = #tpu.dot_dimension_numbers<[1], [0], [0], [1], [0, 0, 1, 1], [], []>} : vector<8x128xbf16>, vector<128x128xbf16>, vector<8x128xf32> -> vector<8x128xf32>
    %cst_25 = arith.constant dense<0.000000e+00> : vector<128xf32>
    %37 = vector.multi_reduction <add>, %36, %cst_25 [0] : vector<8x128xf32> to vector<128xf32>
    %38 = vector.shape_cast %37 : vector<128xf32> to vector<1x128xf32>
    %cst_26 = arith.constant 8.000000e+00 : f32
    %39 = vector.broadcast %cst_26 : f32 to vector<1x128xf32>
    %40 = arith.divf %38, %39 : vector<1x128xf32>
    %41 = vector.broadcast %40 : vector<1x128xf32> to vector<8x128xf32>
    %42 = arith.subf %36, %41 : vector<8x128xf32>
    %43 = arith.mulf %42, %42 : vector<8x128xf32>
    %cst_27 = arith.constant dense<0.000000e+00> : vector<128xf32>
    %44 = vector.multi_reduction <add>, %43, %cst_27 [0] : vector<8x128xf32> to vector<128xf32>
    %45 = vector.shape_cast %44 : vector<128xf32> to vector<1x128xf32>
    %cst_28 = arith.constant 8.000000e+00 : f32
    %46 = vector.broadcast %cst_28 : f32 to vector<1x128xf32>
    %47 = arith.divf %45, %46 : vector<1x128xf32>
    %cst_29 = arith.constant 9.99999974E-6 : f32
    %48 = vector.broadcast %cst_29 : f32 to vector<1x128xf32>
    %49 = arith.addf %47, %48 : vector<1x128xf32>
    %50 = math.rsqrt %49 : vector<1x128xf32>
    %51 = arith.mulf %33, %50 : vector<1x128xf32>
    %52 = vector.broadcast %51 : vector<1x128xf32> to vector<8x128xf32>
    %53 = arith.mulf %42, %52 : vector<8x128xf32>
    %54 = vector.broadcast %34 : vector<1x128xf32> to vector<8x128xf32>
    %55 = arith.addf %53, %54 : vector<8x128xf32>
    %cst_30 = arith.constant 0.000000e+00 : f32
    %56 = vector.broadcast %cst_30 : f32 to vector<8x128xf32>
    %57 = arith.maximumf %55, %56 : vector<8x128xf32>
    %c0_31 = arith.constant 0 : index
    %c0_32 = arith.constant 0 : index
    %58 = vector.load %arg9[%c0_31, %c0_32] : memref<128x128xbf16, #tpu.memory_space<vmem>>, vector<128x128xbf16>
    %c0_33 = arith.constant 0 : index
    %c0_34 = arith.constant 0 : index
    %59 = vector.load %arg10[%c0_33, %c0_34] : memref<1x128xf32, #tpu.memory_space<vmem>>, vector<1x128xf32>
    %c0_35 = arith.constant 0 : index
    %c0_36 = arith.constant 0 : index
    %60 = vector.load %arg11[%c0_35, %c0_36] : memref<1x128xf32, #tpu.memory_space<vmem>>, vector<1x128xf32>
    %61 = arith.truncf %57 : vector<8x128xf32> to vector<8x128xbf16>
    %cst_37 = arith.constant dense<0.000000e+00> : vector<8x128xf32>
    %62 = tpu.matmul %61, %58, %cst_37 {dimension_numbers = #tpu.dot_dimension_numbers<[1], [0], [0], [1], [0, 0, 1, 1], [], []>} : vector<8x128xbf16>, vector<128x128xbf16>, vector<8x128xf32> -> vector<8x128xf32>
    %cst_38 = arith.constant dense<0.000000e+00> : vector<128xf32>
    %63 = vector.multi_reduction <add>, %62, %cst_38 [0] : vector<8x128xf32> to vector<128xf32>
    %64 = vector.shape_cast %63 : vector<128xf32> to vector<1x128xf32>
    %cst_39 = arith.constant 8.000000e+00 : f32
    %65 = vector.broadcast %cst_39 : f32 to vector<1x128xf32>
    %66 = arith.divf %64, %65 : vector<1x128xf32>
    %67 = vector.broadcast %66 : vector<1x128xf32> to vector<8x128xf32>
    %68 = arith.subf %62, %67 : vector<8x128xf32>
    %69 = arith.mulf %68, %68 : vector<8x128xf32>
    %cst_40 = arith.constant dense<0.000000e+00> : vector<128xf32>
    %70 = vector.multi_reduction <add>, %69, %cst_40 [0] : vector<8x128xf32> to vector<128xf32>
    %71 = vector.shape_cast %70 : vector<128xf32> to vector<1x128xf32>
    %cst_41 = arith.constant 8.000000e+00 : f32
    %72 = vector.broadcast %cst_41 : f32 to vector<1x128xf32>
    %73 = arith.divf %71, %72 : vector<1x128xf32>
    %cst_42 = arith.constant 9.99999974E-6 : f32
    %74 = vector.broadcast %cst_42 : f32 to vector<1x128xf32>
    %75 = arith.addf %73, %74 : vector<1x128xf32>
    %76 = math.rsqrt %75 : vector<1x128xf32>
    %77 = arith.mulf %59, %76 : vector<1x128xf32>
    %78 = vector.broadcast %77 : vector<1x128xf32> to vector<8x128xf32>
    %79 = arith.mulf %68, %78 : vector<8x128xf32>
    %80 = vector.broadcast %60 : vector<1x128xf32> to vector<8x128xf32>
    %81 = arith.addf %79, %80 : vector<8x128xf32>
    %82 = math.tanh %81 : vector<8x128xf32>
    %c0_43 = arith.constant 0 : index
    %c0_44 = arith.constant 0 : index
    %83 = vector.load %arg12[%c0_43, %c0_44] : memref<8x128xf32, #tpu.memory_space<vmem>>, vector<8x128xf32>
    tpu.vector_store %arg12[%c0_43, %c0_44], %82 {strides = array<i32>} : memref<8x128xf32, #tpu.memory_space<vmem>>, vector<8x128xf32>,
    return
  }
}

</mosaic_0001>

<bundles_post_ra>
// kernel: tpu_custom_call.1
= control target key start
LH: loop header
LB: loop body
LE: loop exit
PB: predicated region body
PF: predicated region fallthrough
CT: control target
= control target key end

     0   :  { %17 = vsyncpa [#allocation3], 0  ;;  %s1029_s0 = inlined_call_operand.hbm [shape: f32[8,16], index: 0, kind: input, shape index: {}]   ;;  %s1030_s1 = inlined_call_operand.hbm [shape: f32[8,8], index: 1, kind: input, shape index: {}]   ;;  %s1031_s2 = inlined_call_operand.hbm [shape: bf16[16,128], index: 2, kind: input, shape index: {}]   ;;  %s1032_s3 = inlined_call_operand.vmem [shape: bf16[8,128], index: 3, kind: input, shape index: {}]   ;;  %s1033_s4 = inlined_call_operand.vmem [shape: f32[1,128], index: 4, kind: input, shape index: {}]   ;;  %s1034_s5 = inlined_call_operand.vmem [shape: f32[1,128], index: 5, kind: input, shape index: {}]   ;;  %s1035_s6 = inlined_call_operand.hbm [shape: bf16[128,128], index: 6, kind: input, shape index: {}]   ;;  %s1036_s7 = inlined_call_operand.vmem [shape: f32[1,128], index: 7, kind: input, shape index: {}]   ;;  %s1037_s8 = inlined_call_operand.vmem [shape: f32[1,128], index: 8, kind: input, shape index: {}]   ;;  %s1038_s9 = inlined_call_operand.hbm [shape: bf16[128,128], index: 9, kind: input, shape index: {}]   ;;  %s1039_s10 = inlined_call_operand.vmem [shape: f32[1,128], index: 10, kind: input, shape index: {}]   ;;  %s1040_s11 = inlined_call_operand.vmem [shape: f32[1,128], index: 11, kind: input, shape index: {}]   ;;  %s1041_s12 = inlined_call_operand.hbm [shape: f32[8,128], index: 12, kind: output, shape index: {}]  }
   0x1   :  { %18 = vsyncpa [#allocation6], 0 }
   0x2   :  { %19 = vsyncpa [#allocation9], 0 }
   0x3   :  { %20 = vsyncpa [#allocation4], 0  ;;  %s821_s21 = smov [#allocation5]   ;;  %s681_s25 = scalar_lea.hbm %s1030_s1, 128 }
   0x4   :  { %s37_s22 = sshll.u32 %s821_s21, 4  ;;  %p682_p0 = scmp.ne.s32.totalorder %s1030_s1, %s681_s25  ;;  %s38_s22 = int_to_ptr.vmem [resolvable:$true] %s37_s22 }
   0x5   :  { %p685_p1 = scmp.lt.u32.totalorder %s681_s25, %s1030_s1 }
   0x7   :  { %p687_p2 = pnand %p685_p1, %p682_p0 }
   0x9   :  { %690 = shalt.err (!%p687_p2)
}
   0xa   :  { %s691_s30 = scalar_lea.vmem %s38_s22, 128  ;;  %p696_p4 = scmp.lt.s32.totalorder %s38_s22, %s38_s22 }
   0xb   :  { %p692_p3 = scmp.ne.s32.totalorder %s38_s22, %s691_s30  ;;  %p697_p5 = scmp.lt.s32.totalorder %s691_s30, %s691_s30 }
   0xd   :  { %p698_p6 = por %p697_p5, %p696_p4 }
   0xf   :  { %p699_p7 = pnand %p698_p6, %p692_p3 }
  0x11   :  { %702 = shalt.err (!%p699_p7)
}
  0x12   :  { %40 = dma.hbm_to_vmem [thread:$0]  %s1030_s1, 128, %s38_s22, [#allocation6]  }
  0x13   :  { %s822_s15 = smov [#allocation8]   ;;  %s823_s17 = smov [#allocation2]  }
  0x14   :  { %s64_s16 = sshll.u32 %s822_s15, 4  ;;  %s27_s18 = sshll.u32 %s823_s17, 4  ;;  %s65_s16 = int_to_ptr.vmem [resolvable:$true] %s64_s16  ;;  %s28_s18 = int_to_ptr.vmem [resolvable:$true] %s27_s18 }
  0x15   :  { %s703_s21 = scalar_lea.hbm %s1035_s6, 1024 }
  0x16   :  { %p704_p8 = scmp.ne.s32.totalorder %s1035_s6, %s703_s21  ;;  %p707_p9 = scmp.lt.u32.totalorder %s703_s21, %s1035_s6 }
  0x18   :  { %p709_p10 = pnand %p707_p9, %p704_p8 }
  0x1a   :  { %712 = shalt.err (!%p709_p10)
}
  0x1b   :  { %s713_s1 = scalar_lea.vmem %s65_s16, 1024  ;;  %p718_p12 = scmp.lt.s32.totalorder %s65_s16, %s65_s16 }
  0x1c   :  { %p714_p11 = scmp.ne.s32.totalorder %s65_s16, %s713_s1  ;;  %p719_p13 = scmp.lt.s32.totalorder %s713_s1, %s713_s1 }
  0x1e   :  { %p720_p0 = por %p719_p13, %p718_p12 }
  0x20   :  { %p721_p1 = pnand %p720_p0, %p714_p11 }
  0x22   :  { %724 = shalt.err (!%p721_p1)
}
  0x23   :  { %s824_s22 = smov 64   ;;  %s825_s27 = smov 4  }
  0x24   :  { %70 = dma.hbm_to_vmem [thread:$0]  %s1035_s6, 1024, %s65_s16, [#allocation9], %s824_s22, %s824_s22, %s825_s27  }
  0x25   :  { %s725_s14 = scalar_lea.hbm %s1029_s0, 128 }
  0x26   :  { %p726_p2 = scmp.ne.s32.totalorder %s1029_s0, %s725_s14  ;;  %p729_p3 = scmp.lt.u32.totalorder %s725_s14, %s1029_s0 }
  0x28   :  { %p731_p4 = pnand %p729_p3, %p726_p2 }
  0x2a   :  { %734 = shalt.err (!%p731_p4)
}
  0x2b   :  { %s735_s21 = scalar_lea.vmem %s28_s18, 128  ;;  %p740_p6 = scmp.lt.s32.totalorder %s28_s18, %s28_s18 }
  0x2c   :  { %p736_p5 = scmp.ne.s32.totalorder %s28_s18, %s735_s21  ;;  %p741_p7 = scmp.lt.s32.totalorder %s735_s21, %s735_s21 }
  0x2e   :  { %p742_p8 = por %p741_p7, %p740_p6 }
  0x30   :  { %p743_p9 = pnand %p742_p8, %p736_p5 }
  0x32   :  { %746 = shalt.err (!%p743_p9)
}
  0x33   :  { %30 = dma.hbm_to_vmem [thread:$0]  %s1029_s0, 128, %s28_s18, [#allocation3]  }
  0x34   :  { %s826_s23 = smov [#allocation7]   ;;  %s827_s25 = smov [#allocation10]  }
  0x35   :  { %s46_s24 = sshll.u32 %s826_s23, 4  ;;  %s80_s26 = sshll.u32 %s827_s25, 4  ;;  %s47_s24 = int_to_ptr.vmem [resolvable:$true] %s46_s24  ;;  %s81_s26 = int_to_ptr.vmem [resolvable:$true] %s80_s26 }
  0x36   :  { %s747_s29 = scalar_lea.hbm %s1031_s2, 128 }
  0x37   :  { %p748_p10 = scmp.ne.s32.totalorder %s1031_s2, %s747_s29  ;;  %p751_p11 = scmp.lt.u32.totalorder %s747_s29, %s1031_s2 }
  0x39   :  { %p753_p12 = pnand %p751_p11, %p748_p10 }
  0x3b   :  { %756 = shalt.err (!%p753_p12)
}
  0x3c   :  { %s757_s0 = scalar_lea.vmem %s47_s24, 128  ;;  %p762_p0 = scmp.lt.s32.totalorder %s47_s24, %s47_s24 }
  0x3d   :  { %p758_p13 = scmp.ne.s32.totalorder %s47_s24, %s757_s0  ;;  %p763_p1 = scmp.lt.s32.totalorder %s757_s0, %s757_s0 }
  0x3f   :  { %p764_p2 = por %p763_p1, %p762_p0 }
  0x41   :  { %p765_p3 = pnand %p764_p2, %p758_p13 }
  0x43   :  { %768 = shalt.err (!%p765_p3)
}
  0x44   :  { %52 = dma.hbm_to_vmem [thread:$0]  %s1031_s2, 128, %s47_s24, [#allocation6], %s824_s22, %s824_s22, %s825_s27  }
  0x45   :  { %s769_s21 = scalar_lea.hbm %s1038_s9, 1024 }
  0x46   :  { %p770_p4 = scmp.ne.s32.totalorder %s1038_s9, %s769_s21  ;;  %p773_p5 = scmp.lt.u32.totalorder %s769_s21, %s1038_s9 }
  0x48   :  { %p775_p6 = pnand %p773_p5, %p770_p4 }
  0x4a   :  { %778 = shalt.err (!%p775_p6)
}
  0x4b   :  { %s779_s1 = scalar_lea.vmem %s81_s26, 1024  ;;  %p784_p8 = scmp.lt.s32.totalorder %s81_s26, %s81_s26 }
  0x4c   :  { %p780_p7 = scmp.ne.s32.totalorder %s81_s26, %s779_s1  ;;  %p785_p9 = scmp.lt.s32.totalorder %s779_s1, %s779_s1 }
  0x4e   :  { %p786_p10 = por %p785_p9, %p784_p8 }
  0x50   :  { %p787_p11 = pnand %p786_p10, %p780_p7 }
  0x52   :  { %790 = shalt.err (!%p787_p11)
}
  0x53   :  { %86 = dma.hbm_to_vmem [thread:$0]  %s1038_s9, 1024, %s81_s26, [#allocation9], %s824_s22, %s824_s22, %s825_s27  }
  0x54   :  { %813 = dma.done.wait [#allocation3], 128  }
  0x55   :  { %814 = vsyncadd [#allocation3], 4294967168 }
  0x56   :  { %815 = dma.done.wait [#allocation6], 256  }
  0x57   :  { %816 = vsyncadd [#allocation6], 4294967040 }
  0x58   :  { %817 = dma.done.wait [#allocation9], 2048  }
  0x59   :  { %818 = vsyncadd [#allocation9], 4294965248  ;;  %v828_v0 = vmov 0.0   ;;  %vm829_vm0 = vmmov 0   ;;  %vm120_vm1 = vcmask 1043456   ;;  %v656_v3 = vld [vmem:[#allocation7] sm:$0xff]   ;;  %v235_v42 = vlaneseq }
  0x5a   :  { %593 = vmatprep.subr.bf16.mxu1 %v828_v0  ;;  %599 = vmatprep.subr.bf16.mxu0 %v828_v0  ;;  %v109_v1 = vld [vmem:[%s1032_s3] sm:$0xf]  ;;  %v114_v4 = vld [vmem:[#allocation5] sm:$0xff]  ;;  %vm116_vm2 = vcmask 64512   ;;  %vm170_vm3 = vcmask 130048   ;;  %v657_v8 = vld [vmem:[#allocation8] sm:$0xff]  }
  0x5b   :  { %595 = vmatprep.mubr.msk.bf16.mxu1 %vm829_vm0, %v828_v0  ;;  %601 = vmatprep.mubr.msk.bf16.mxu0 %vm829_vm0, %v828_v0  ;;  %v122_v2 = vsel %vm120_vm1, %v109_v1, 0  ;;  %v112_v5 = vld [vmem:[#allocation2] sm:$0xff]  ;;  %v115_v6 = vpack.c.bf16 %v114_v4, %v114_v4  ;;  %v659_v10 = vld [vmem:[#allocation8 + $0x10] sm:$0xff]   ;;  %v660_v11 = vld [vmem:[#allocation8 + $0x18] sm:$0xff]   ;;  %v236_v43 = vshrl.u32 %v235_v42, 7  ;;  %s830_s15 = smov [#allocation11]  }
  0x5c   :  { %594 = vmatpush3.bf16.msra.mxu1 %v122_v2  ;;  %v113_v7 = vpack.c.bf16 %v112_v5, %v112_v5  ;;  %600 = vmatpush3.bf16.msra.mxu0 %v656_v3  ;;  %v658_v9 = vld [vmem:[#allocation8 + $0x8] sm:$0xff]   ;;  %v661_v12 = vld [vmem:[#allocation8 + $0x20] sm:$0xff]   ;;  %v663_v14 = vld [vmem:[#allocation8 + $0x30] sm:$0xff]   ;;  %s538_s0 = sshll.u32 %s830_s15, 4  ;;  %s539_s0 = int_to_ptr.vmem [resolvable:$true] %s538_s0 }
  0x5d   :  { %605 = vmatprep.subr.bf16.mxu1 %v828_v0  ;;  %625 = vmatprep.subr.bf16.mxu0 %v828_v0  ;;  %v662_v13 = vld [vmem:[#allocation8 + $0x28] sm:$0xff]   ;;  %v664_v15 = vld [vmem:[#allocation8 + $0x38] sm:$0xff]   ;;  %v990_v45 = vsub.s32 0, %v236_v43  ;;  %v665_v54 = vld [vmem:[#allocation10] sm:$0xff]   ;;  %s791_s18 = scalar_lea.vmem %s539_s0, 128  ;;  %p796_p13 = scmp.lt.s32.totalorder %s539_s0, %s539_s0 }
  0x5e   :  { %v110_v44 = vld [vmem:[%s1033_s4] sm:$0x1]  ;;  %v667_v56 = vld [vmem:[#allocation10 + $0x10] sm:$0xff]   ;;  %v668_v57 = vld [vmem:[#allocation10 + $0x18] sm:$0xff]   ;;  %p792_p12 = scmp.ne.s32.totalorder %s539_s0, %s791_s18  ;;  %p797_p0 = scmp.lt.s32.totalorder %s791_s18, %s791_s18 }
  0x5f   :  { %596 = vmatmul.mubr.msk.bf16.vlgmr.msra.gmra.mrb[0].mxu1 %vm116_vm2, %v115_v6  ;;  %602 = vmatmul.mubr.msk.bf16.vlgmr.msra.gmra.mrb[0].mxu0 %vm170_vm3, %v113_v7  ;;  %v552_v49 = vld [vmem:[%s1034_s5] ss:$0 sm:$0xff]  ;;  %v669_v58 = vld [vmem:[#allocation10 + $0x20] sm:$0xff]   ;;  %v671_v60 = vld [vmem:[#allocation10 + $0x30] sm:$0xff]  }
  0x60   :  { %621 = vmatprep.mubr.msk.bf16.mxu1 %vm829_vm0, %v828_v0  ;;  %641 = vmatprep.mubr.msk.bf16.mxu0 %vm829_vm0, %v828_v0  ;;  %v666_v55 = vld [vmem:[#allocation10 + $0x8] sm:$0xff]   ;;  %v672_v61 = vld [vmem:[#allocation10 + $0x38] sm:$0xff]   ;;  %p798_p1 = por %p797_p0, %p796_p13 }
  0x61   :  { %606 = vmatpush3.bf16.msra.mxu1 %v657_v8  ;;  %626 = vmatpush3.bf16.msra.mxu0 %v665_v54  ;;  %v670_v59 = vld [vmem:[#allocation10 + $0x28] sm:$0xff]  }
  0x62   :  { %607 = vmatprep.subr.bf16.mxu1 %v828_v0  ;;  %627 = vmatprep.subr.bf16.mxu0 %v828_v0  ;;  %v570_v54 = vld [vmem:[%s1040_s11] ss:$0 sm:$0xff]  ;;  %p799_p2 = pnand %p798_p1, %p792_p12 }
  0x65   :  { %608 = vmatpush3.bf16.msra.mxu1 %v658_v9  ;;  %628 = vmatpush3.bf16.msra.mxu0 %v666_v55 }
  0x66   :  { %609 = vmatprep.subr.bf16.mxu1 %v828_v0  ;;  %629 = vmatprep.subr.bf16.mxu0 %v828_v0 }
  0x69   :  { %610 = vmatpush3.bf16.msra.mxu1 %v659_v10  ;;  %630 = vmatpush3.bf16.msra.mxu0 %v667_v56 }
  0x6a   :  { %611 = vmatprep.subr.bf16.mxu1 %v828_v0  ;;  %631 = vmatprep.subr.bf16.mxu0 %v828_v0 }
  0x6d   :  { %612 = vmatpush3.bf16.msra.mxu1 %v660_v11  ;;  %632 = vmatpush3.bf16.msra.mxu0 %v668_v57 }
  0x6e   :  { %613 = vmatprep.subr.bf16.mxu1 %v828_v0  ;;  %633 = vmatprep.subr.bf16.mxu0 %v828_v0 }
  0x71   :  { %614 = vmatpush3.bf16.msra.mxu1 %v661_v12  ;;  %634 = vmatpush3.bf16.msra.mxu0 %v669_v58 }
  0x72   :  { %615 = vmatprep.subr.bf16.mxu1 %v828_v0  ;;  %635 = vmatprep.subr.bf16.mxu0 %v828_v0 }
  0x75   :  { %616 = vmatpush3.bf16.msra.mxu1 %v662_v13  ;;  %636 = vmatpush3.bf16.msra.mxu0 %v670_v59 }
  0x76   :  { %617 = vmatprep.subr.bf16.mxu1 %v828_v0  ;;  %637 = vmatprep.subr.bf16.mxu0 %v828_v0 }
  0x79   :  { %618 = vmatpush3.bf16.msra.mxu1 %v663_v14  ;;  %638 = vmatpush3.bf16.msra.mxu0 %v671_v60 }
  0x7a   :  { %619 = vmatprep.subr.bf16.mxu1 %v828_v0  ;;  %639 = vmatprep.subr.bf16.mxu0 %v828_v0 }
  0x7d   :  { %620 = vmatpush3.bf16.msra.mxu1 %v664_v15  ;;  %640 = vmatpush3.bf16.msra.mxu0 %v672_v61 }
 0x132   :  { %v158_v16 = vpop.f32.mrb[0].mxu1  ;;  %v208_v18 = vpop.f32.mrb[0].mxu0 }
 0x133   :  { %v597_v17 = vpop.f32.mrb[1].mxu1  ;;  %v209_v19 = vadd.f32 %v208_v18, %v158_v16  ;;  %v603_v21 = vpop.f32.mrb[1].mxu0 }
 0x134   :  { %v161_v20 = vpop.f32.mrb[2].mxu1  ;;  %v211_v23 = vpop.f32.mrb[2].mxu0 }
 0x135   :  { %v598_v22 = vpop.f32.mrb[3].mxu1  ;;  %v214_v24 = vrot.slane %v209_v19, 4  ;;  %v604_v25 = vpop.f32.mrb[3].mxu0  ;;  %v561_v23 = vld [vmem:[%s1037_s8] ss:$0 sm:$0xff] }
 0x137   :  { %v215_v26 = vadd.f32 %v214_v24, %v209_v19 }
 0x139   :  { %v216_v27 = vrot.slane %v215_v26, 2 }
 0x13b   :  { %v217_v28 = vadd.f32 %v216_v27, %v215_v26 }
 0x13d   :  { %v218_v29 = vrot.slane %v217_v28, 1 }
 0x13f   :  { %v219_v30 = vadd.f32 %v218_v29, %v217_v28 }
 0x141   :  { %v221_v31 = vmul.f32 0.125, %v219_v30 }
 0x143   :  { %v222_v32 = vsub.f32 %v209_v19, %v221_v31  ;;  %v265_v19 = vld [vmem:[%s1036_s7] sm:$0x1] }
 0x145   :  { %v223_v33 = vmul.f32 %v222_v32, %v222_v32 }
 0x147   :  { %v224_v34 = vrot.slane %v223_v33, 4 }
 0x149   :  { %v225_v35 = vadd.f32 %v224_v34, %v223_v33 }
 0x14b   :  { %v226_v36 = vrot.slane %v225_v35, 2 }
 0x14d   :  { %v227_v37 = vadd.f32 %v226_v36, %v225_v35 }
 0x14f   :  { %v228_v38 = vrot.slane %v227_v37, 1 }
 0x151   :  { %v229_v39 = vadd.f32 %v228_v38, %v227_v37 }
 0x153   :  { %v230_v40 = vmul.f32 0.125, %v229_v39 }
 0x155   :  { %v231_v41 = vadd.f32 1e-05, %v230_v40 }
 0x157   :  { %673 = vrsqrt.f32 %v231_v41 }
 0x161   :  { %v674_v46 = vpop.eup %673 }
 0x162   :  { %v233_v47 = vmul.f32 %v674_v46, %v110_v44 }
 0x164   :  { %v238_v48 = vrot.slane %v233_v47, %v990_v45 }
 0x166   :  { %v240_v50 = vmul.f32 %v238_v48, %v222_v32 }
 0x168   :  { %v247_v51 = vadd.f32 %v552_v49, %v240_v50  ;;  %v406_v50 = vld [vmem:[%s1039_s10] sm:$0x1] }
 0x16a   :  { %v248_v52 = vmax.f32 %v247_v51, 0.0 }
 0x16c   :  { %v267_v53 = vpack.c.bf16 %v248_v52, %v248_v52 }
 0x16e   :  { %622 = vmatmul.mubr.bf16.vlgmr.msra.gmra.mrb[4].mxu1 %v267_v53 }
 0x241   :  { %v350_v62 = vpop.f32.mrb[4].mxu1 }
 0x242   :  { %v356_v63 = vrot.slane %v350_v62, 4  ;;  %v623_v1 = vpop.f32.mrb[5].mxu1 }
 0x243   :  { %v353_v2 = vpop.f32.mrb[6].mxu1 }
 0x244   :  { %v357_v3 = vadd.f32 %v356_v63, %v350_v62  ;;  %v624_v4 = vpop.f32.mrb[7].mxu1 }
 0x246   :  { %v358_v5 = vrot.slane %v357_v3, 2 }
 0x248   :  { %v359_v6 = vadd.f32 %v358_v5, %v357_v3 }
 0x24a   :  { %v360_v7 = vrot.slane %v359_v6, 1 }
 0x24c   :  { %v361_v8 = vadd.f32 %v360_v7, %v359_v6 }
 0x24e   :  { %v362_v9 = vmul.f32 0.125, %v361_v8 }
 0x250   :  { %v363_v10 = vsub.f32 %v350_v62, %v362_v9 }
 0x252   :  { %v364_v11 = vmul.f32 %v363_v10, %v363_v10 }
 0x254   :  { %v365_v12 = vrot.slane %v364_v11, 4 }
 0x256   :  { %v366_v13 = vadd.f32 %v365_v12, %v364_v11 }
 0x258   :  { %v367_v14 = vrot.slane %v366_v13, 2 }
 0x25a   :  { %v368_v15 = vadd.f32 %v367_v14, %v366_v13 }
 0x25c   :  { %v369_v0 = vrot.slane %v368_v15, 1 }
 0x25e   :  { %v370_v16 = vadd.f32 %v369_v0, %v368_v15 }
 0x260   :  { %v371_v17 = vmul.f32 0.125, %v370_v16 }
 0x262   :  { %v372_v18 = vadd.f32 1e-05, %v371_v17 }
 0x264   :  { %675 = vrsqrt.f32 %v372_v18 }
 0x26e   :  { %v676_v20 = vpop.eup %675 }
 0x26f   :  { %v374_v21 = vmul.f32 %v676_v20, %v265_v19 }
 0x271   :  { %v379_v22 = vrot.slane %v374_v21, %v990_v45 }
 0x273   :  { %v381_v24 = vmul.f32 %v379_v22, %v363_v10 }
 0x275   :  { %v388_v25 = vadd.f32 %v561_v23, %v381_v24 }
 0x277   :  { %v389_v26 = vmax.f32 %v388_v25, 0.0 }
 0x279   :  { %v408_v27 = vpack.c.bf16 %v389_v26, %v389_v26 }
 0x27b   :  { %642 = vmatmul.mubr.bf16.vlgmr.msra.gmra.mrb[4].mxu0 %v408_v27 }
 0x34e   :  { %v491_v28 = vpop.f32.mrb[4].mxu0 }
 0x34f   :  { %v497_v29 = vrot.slane %v491_v28, 4  ;;  %v643_v30 = vpop.f32.mrb[5].mxu0 }
 0x350   :  { %v494_v31 = vpop.f32.mrb[6].mxu0 }
 0x351   :  { %v498_v32 = vadd.f32 %v497_v29, %v491_v28  ;;  %v644_v33 = vpop.f32.mrb[7].mxu0 }
 0x353   :  { %v499_v34 = vrot.slane %v498_v32, 2 }
 0x355   :  { %v500_v35 = vadd.f32 %v499_v34, %v498_v32 }
 0x357   :  { %v501_v36 = vrot.slane %v500_v35, 1 }
 0x359   :  { %v502_v37 = vadd.f32 %v501_v36, %v500_v35 }
 0x35b   :  { %v503_v38 = vmul.f32 0.125, %v502_v37 }
 0x35d   :  { %v504_v39 = vsub.f32 %v491_v28, %v503_v38 }
 0x35f   :  { %v505_v40 = vmul.f32 %v504_v39, %v504_v39 }
 0x361   :  { %v506_v41 = vrot.slane %v505_v40, 4 }
 0x363   :  { %v507_v42 = vadd.f32 %v506_v41, %v505_v40 }
 0x365   :  { %v508_v43 = vrot.slane %v507_v42, 2 }
 0x367   :  { %v509_v44 = vadd.f32 %v508_v43, %v507_v42 }
 0x369   :  { %v510_v46 = vrot.slane %v509_v44, 1 }
 0x36b   :  { %v511_v47 = vadd.f32 %v510_v46, %v509_v44 }
 0x36d   :  { %v512_v48 = vmul.f32 0.125, %v511_v47 }
 0x36f   :  { %v513_v49 = vadd.f32 1e-05, %v512_v48 }
 0x371   :  { %677 = vrsqrt.f32 %v513_v49 }
 0x37b   :  { %v678_v51 = vpop.eup %677 }
 0x37c   :  { %v515_v52 = vmul.f32 %v678_v51, %v406_v50 }
 0x37e   :  { %v520_v53 = vrot.slane %v515_v52, %v990_v45 }
 0x380   :  { %v522_v55 = vmul.f32 %v520_v53, %v504_v39 }
 0x382   :  { %v529_v56 = vadd.f32 %v570_v54, %v522_v55 }
 0x384   :  { %679 = vtanh.f32 %v529_v56 }
 0x38e   :  { %v680_v57 = vpop.eup %679 }
 0x38f   :  { %531 = vst [vmem:[#allocation11] sm:$0xff] %v680_v57 }
 0x390   :  { %802 = shalt.err (!%p799_p2)
}
 0x391   :  { %s803_s19 = scalar_lea.hbm %s1041_s12, 128 }
 0x392   :  { %p804_p3 = scmp.ne.s32.totalorder %s1041_s12, %s803_s19  ;;  %p807_p4 = scmp.lt.u32.totalorder %s803_s19, %s1041_s12 }
 0x394   :  { %p809_p5 = pnand %p807_p4, %p804_p3 }
 0x396   :  { %812 = shalt.err (!%p809_p5)
}
 0x397   :  { %541 = dma.vmem_to_hbm [thread:$0]  %s539_s0, 128, %s1041_s12, [#allocation4]  }
 0x398   :  { %819 = dma.done.wait [#allocation4], 128  }
 0x399   :  { %820 = vsyncadd [#allocation4], 4294967168 }
 0x39a   :  { %545 = vsyncpa [#allocation3], 1 }
 0x39b   :  { %546 = vsyncpa [#allocation6], 1 }
 0x39c   :  { %547 = vsyncpa [#allocation9], 1 }
 0x39d   :  { %548 = vsyncpa [#allocation4], 1 }

</bundles_post_ra>
